<compile_context>
chip_gen: v5e
topology: v5e:2x2
jax: 0.10.0
libtpu: 0.0.40
codegen_flags: <defaults>
</compile_context>

<pallas_src>
import math

import jax
import jax.numpy as jnp
import numpy as np
from jax.experimental import pallas as pl
from jax.experimental.pallas import tpu as pltpu


# ----------------------------------------------------------------------------
# Kernel 1: hoisted input projection (one big MXU matmul, both directions)
# ----------------------------------------------------------------------------
def input_gates_kernel(x_ref, wf_ref, wb_ref, bf_ref, bb_ref, gf_ref, gb_ref):
    """gf = x @ Wih_f^T + (b_ih_f + b_hh_f); gb likewise for the backward dir.

    x_ref  : (tm, D)   bf16
    w*_ref : (D, 4H)   bf16  (pre-transposed)
    b*_ref : (1, 4H)   f32
    g*_ref : (tm, 4H)  f32
    """
    x = x_ref[...]
    gf_ref[...] = (jnp.dot(x, wf_ref[...], preferred_element_type=jnp.float32)
                   + bf_ref[...])
    gb_ref[...] = (jnp.dot(x, wb_ref[...], preferred_element_type=jnp.float32)
                   + bb_ref[...])


# ----------------------------------------------------------------------------
# Kernel 2: fused forward+backward LSTM recurrence (grid over time, sequential)
# ----------------------------------------------------------------------------
def bilstm_recurrence_kernel(gf_ref, gb_ref, whhf_hbm, whhb_hbm,
                             hf_out, hb_out,
                             whhf_v, whhb_v, hf_s, cf_s, hb_s, cb_s, w_sem):
    """gf_ref : (1, B, 4H) f32   forward  input-gates at time t
       gb_ref : (1, B, 4H) f32   backward input-gates at time T-1-t
       whh*_hbm : (H, 4H)  bf16  recurrent weights, left in HBM (pl.ANY)
       hf_out/hb_out : (T, B, H) f32  full outputs, VMEM-resident, one writeback
       whh*_v : VMEM single-buffered weight copies
       h*_s/c*_s : (B, H) f32   recurrent state (persists across grid steps)
    """
    t = pl.program_id(0)
    T = pl.num_programs(0)
    H = hf_s.shape[1]

    @pl.when(t == 0)
    def _():
        cp_f = pltpu.make_async_copy(whhf_hbm, whhf_v, w_sem.at[0])
        cp_b = pltpu.make_async_copy(whhb_hbm, whhb_v, w_sem.at[1])
        cp_f.start()
        cp_b.start()
        hf_s[...] = jnp.zeros_like(hf_s)
        cf_s[...] = jnp.zeros_like(cf_s)
        hb_s[...] = jnp.zeros_like(hb_s)
        cb_s[...] = jnp.zeros_like(cb_s)
        cp_f.wait()
        cp_b.wait()

    def cell(gates, c_prev):
        # NOTE: with H < 128 these slices cut inside a lane vreg; use H a
        # multiple of 128 in production so they become free tile selects.
        i = jax.nn.sigmoid(gates[:, 0 * H:1 * H])
        f = jax.nn.sigmoid(gates[:, 1 * H:2 * H])
        g = jnp.tanh(gates[:, 2 * H:3 * H])
        o = jax.nn.sigmoid(gates[:, 3 * H:4 * H])
        c_new = f * c_prev + i * g
        h_new = o * jnp.tanh(c_new)
        return h_new, c_new

    gates_f = gf_ref[0] + jnp.dot(hf_s[...].astype(jnp.bfloat16), whhf_v[...],
                                  preferred_element_type=jnp.float32)
    gates_b = gb_ref[0] + jnp.dot(hb_s[...].astype(jnp.bfloat16), whhb_v[...],
                                  preferred_element_type=jnp.float32)

    h_f, c_f = cell(gates_f, cf_s[...])
    h_b, c_b = cell(gates_b, cb_s[...])

    hf_s[...] = h_f
    cf_s[...] = c_f
    hb_s[...] = h_b
    cb_s[...] = c_b

    hf_out[t] = h_f               # forward  output at time t
    hb_out[T - 1 - t] = h_b       # backward output back at its original index


# ----------------------------------------------------------------------------
# Kernel 3: dual-input linear (avoids HBM concat of the two directions)
# ----------------------------------------------------------------------------
def dual_linear_kernel(hf_ref, hb_ref, wf_ref, wb_ref, b_ref, out_ref):
    """out = h_fwd @ W_top + h_bwd @ W_bot + b."""
    out_ref[...] = (
        jnp.dot(hf_ref[...].astype(jnp.bfloat16), wf_ref[...],
                preferred_element_type=jnp.float32)
        + jnp.dot(hb_ref[...].astype(jnp.bfloat16), wb_ref[...],
                  preferred_element_type=jnp.float32)
        + b_ref[...]).astype(out_ref.dtype)


# ----------------------------------------------------------------------------
# Wrappers
# ----------------------------------------------------------------------------
def _row_tile(m):
    return m if m <= 512 else 512


def _input_gates(x2, p):
    """x2: (M, D) bf16 -> (gf, gb) each (M, 4H) f32."""
    M, D = x2.shape
    H4 = p["wih_f"].shape[1]
    tm = _row_tile(M)
    out_struct = jax.ShapeDtypeStruct((M, H4), jnp.float32)
    return pl.pallas_call(
        input_gates_kernel,
        out_shape=(out_struct, out_struct),
        grid=(pl.cdiv(M, tm),),
        in_specs=[
            pl.BlockSpec((tm, D), lambda i: (i, 0)),
            pl.BlockSpec((D, H4), lambda i: (0, 0)),
            pl.BlockSpec((D, H4), lambda i: (0, 0)),
            pl.BlockSpec((1, H4), lambda i: (0, 0)),
            pl.BlockSpec((1, H4), lambda i: (0, 0)),
        ],
        out_specs=[pl.BlockSpec((tm, H4), lambda i: (i, 0)),
                   pl.BlockSpec((tm, H4), lambda i: (i, 0))],
        compiler_params=pltpu.CompilerParams(
            dimension_semantics=("parallel",)),
    )(x2, p["wih_f"], p["wih_b"], p["b_f"], p["b_b"])


def _bilstm_recurrence(gf, gb, whh_f, whh_b):
    """gf/gb: (T, B, 4H) f32; whh_*: (H, 4H) bf16 -> (hf, hb) each (T,B,H)."""
    T, B, H4 = gf.shape
    H = H4 // 4
    out_struct = jax.ShapeDtypeStruct((T, B, H), jnp.float32)
    return pl.pallas_call(
        bilstm_recurrence_kernel,
        out_shape=(out_struct, out_struct),
        grid=(T,),
        in_specs=[
            pl.BlockSpec((1, B, H4), lambda t: (t, 0, 0)),
            pl.BlockSpec((1, B, H4), lambda t: (T - 1 - t, 0, 0)),
            pl.BlockSpec(memory_space=pl.ANY),   # Whh_f stays in HBM
            pl.BlockSpec(memory_space=pl.ANY),   # Whh_b stays in HBM
        ],
        out_specs=[
            pl.BlockSpec((T, B, H), lambda t: (0, 0, 0)),   # VMEM-resident
            pl.BlockSpec((T, B, H), lambda t: (0, 0, 0)),   # VMEM-resident
        ],
        scratch_shapes=[
            pltpu.VMEM((H, H4), jnp.bfloat16),   # Whh_f copy (single buffer)
            pltpu.VMEM((H, H4), jnp.bfloat16),   # Whh_b copy
            pltpu.VMEM((B, H), jnp.float32),     # h_fwd
            pltpu.VMEM((B, H), jnp.float32),     # c_fwd
            pltpu.VMEM((B, H), jnp.float32),     # h_bwd
            pltpu.VMEM((B, H), jnp.float32),     # c_bwd
            pltpu.SemaphoreType.DMA((2,)),
        ],
        compiler_params=pltpu.CompilerParams(
            dimension_semantics=("arbitrary",),   # time loop MUST stay serial
            vmem_limit_bytes=64 * 1024 * 1024),
    )(gf, gb, whh_f, whh_b)


def _dual_linear(hf2, hb2, p):
    """hf2/hb2: (M, H) f32 -> (M, N) f32."""
    M, H = hf2.shape
    N = p["w_lin_f"].shape[1]
    tm = _row_tile(M)
    return pl.pallas_call(
        dual_linear_kernel,
        out_shape=jax.ShapeDtypeStruct((M, N), jnp.float32),
        grid=(pl.cdiv(M, tm),),
        in_specs=[
            pl.BlockSpec((tm, H), lambda i: (i, 0)),
            pl.BlockSpec((tm, H), lambda i: (i, 0)),
            pl.BlockSpec((H, N), lambda i: (0, 0)),
            pl.BlockSpec((H, N), lambda i: (0, 0)),
            pl.BlockSpec((1, N), lambda i: (0, 0)),
        ],
        out_specs=pl.BlockSpec((tm, N), lambda i: (i, 0)),
        compiler_params=pltpu.CompilerParams(
            dimension_semantics=("parallel",)),
    )(hf2, hb2, p["w_lin_f"], p["w_lin_b"], p["b_lin"])


def bidirectional_lstm(x, p):
    """BidirectionalLSTM.forward: x [B, T, input_size] -> [B, T, output_size]."""
    B, T, D = x.shape
    H = p["whh_f"].shape[0]

    # Time-major, bf16 for the MXU input projection (single fused transpose+cast).
    x_tbd = jnp.transpose(x, (1, 0, 2)).astype(jnp.bfloat16)        # (T, B, D)
    x2 = x_tbd.reshape(T * B, D)

    gf2, gb2 = _input_gates(x2, p)                                  # (T*B, 4H)
    gf = gf2.reshape(T, B, 4 * H)
    gb = gb2.reshape(T, B, 4 * H)

    hf, hb = _bilstm_recurrence(gf, gb, p["whh_f"], p["whh_b"])     # (T, B, H)

    out2 = _dual_linear(hf.reshape(T * B, H), hb.reshape(T * B, H), p)
    N = out2.shape[1]
    # Single transpose at the very end back to batch_first.
    return jnp.transpose(out2.reshape(T, B, N), (1, 0, 2))          # (B, T, N)


# ----------------------------------------------------------------------------
# Deterministic parameter init (mirrors nn.LSTM.reset_parameters +
# normal_init(linear, std=0.01) with zero bias).  Weights stored pre-transposed
# and cast to bf16; biases (b_ih + b_hh) kept in f32.
# ----------------------------------------------------------------------------
def init_bilstm_params(key, input_size, hidden_size, output_size):
    ks = jax.random.split(key, 9)
    bound = 1.0 / math.sqrt(hidden_size)

    def u(k, shape):
        return jax.random.uniform(k, shape, jnp.float32, -bound, bound)

    wih_f = u(ks[0], (4 * hidden_size, input_size))
    whh_f = u(ks[1], (4 * hidden_size, hidden_size))
    bih_f = u(ks[2], (4 * hidden_size,))
    bhh_f = u(ks[3], (4 * hidden_size,))

    wih_b = u(ks[4], (4 * hidden_size, input_size))
    whh_b = u(ks[5], (4 * hidden_size, hidden_size))
    bih_b = u(ks[6], (4 * hidden_size,))
    bhh_b = u(ks[7], (4 * hidden_size,))

    w_lin = (jax.random.normal(ks[8], (output_size, 2 * hidden_size),
                               jnp.float32) * 0.01)
    b_lin = jnp.zeros((output_size,), jnp.float32)

    bf16 = jnp.bfloat16
    return dict(
        wih_f=wih_f.T.astype(bf16), whh_f=whh_f.T.astype(bf16),
        b_f=(bih_f + bhh_f)[None, :],
        wih_b=wih_b.T.astype(bf16), whh_b=whh_b.T.astype(bf16),
        b_b=(bih_b + bhh_b)[None, :],
        w_lin_f=w_lin[:, :hidden_size].T.astype(bf16),   # rows multiplying h_fwd
        w_lin_b=w_lin[:, hidden_size:].T.astype(bf16),   # rows multiplying h_bwd
        b_lin=b_lin[None, :],
    )


# ----------------------------------------------------------------------------
# Pure-JAX reference (same bf16-matmul / f32-state numerics as the kernels)
# ----------------------------------------------------------------------------
def _lstm_scan_ref(gates_in, whh_bf16, H):
    T, B, _ = gates_in.shape

    def step(carry, g_in):
        h, c = carry
        gates = g_in + jnp.dot(h.astype(jnp.bfloat16), whh_bf16,
                               preferred_element_type=jnp.float32)
        i = jax.nn.sigmoid(gates[:, 0 * H:1 * H])
        f = jax.nn.sigmoid(gates[:, 1 * H:2 * H])
        g = jnp.tanh(gates[:, 2 * H:3 * H])
        o = jax.nn.sigmoid(gates[:, 3 * H:4 * H])
        c = f * c + i * g
        h = o * jnp.tanh(c)
        return (h, c), h

    init = (jnp.zeros((B, H), jnp.float32), jnp.zeros((B, H), jnp.float32))
    _, hs = jax.lax.scan(step, init, gates_in)
    return hs


def bidirectional_lstm_ref(x, p):
    B, T, D = x.shape
    H = p["whh_f"].shape[0]
    x_tbd = jnp.transpose(x, (1, 0, 2)).astype(jnp.bfloat16)
    x2 = x_tbd.reshape(T * B, D)
    gf = (jnp.dot(x2, p["wih_f"], preferred_element_type=jnp.float32)
          + p["b_f"]).reshape(T, B, 4 * H)
    gb = (jnp.dot(x2, p["wih_b"], preferred_element_type=jnp.float32)
          + p["b_b"]).reshape(T, B, 4 * H)
    hf = _lstm_scan_ref(gf, p["whh_f"], H)                   # (T, B, H)
    hb = _lstm_scan_ref(gb[::-1], p["whh_b"], H)[::-1]       # reverse direction
    out = (jnp.dot(hf.reshape(T * B, H).astype(jnp.bfloat16), p["w_lin_f"],
                   preferred_element_type=jnp.float32)
           + jnp.dot(hb.reshape(T * B, H).astype(jnp.bfloat16), p["w_lin_b"],
                     preferred_element_type=jnp.float32)
           + p["b_lin"])
    return jnp.transpose(out.reshape(T, B, -1), (1, 0, 2))


# ----------------------------------------------------------------------------
if __name__ == "__main__":
    B, T = 2, 8
    input_size, hidden_size, output_size = 16, 32, 32

    key = jax.random.PRNGKey(0)
    kx, kp = jax.random.split(key)

    x = jax.random.normal(kx, (B, T, input_size), jnp.float32)
    params = init_bilstm_params(kp, input_size, hidden_size, output_size)

    out = jax.block_until_ready(jax.jit(bidirectional_lstm)(x, params))
    assert out.shape == (B, T, output_size), out.shape

    ref = jax.block_until_ready(bidirectional_lstm_ref(x, params))
    np.testing.assert_allclose(np.asarray(out), np.asarray(ref),
                               rtol=2e-3, atol=2e-4)

    print("KERNEL_OK")
</pallas_src>

<mosaic_0001>
module attributes {stable_mosaic.version = 11 : i64} {
  func.func @input_gates_kernel(%arg0: i32, %arg1: memref<16x16xbf16, #tpu.memory_space<vmem>>, %arg2: memref<16x128xbf16, #tpu.memory_space<vmem>>, %arg3: memref<16x128xbf16, #tpu.memory_space<vmem>>, %arg4: memref<1x128xf32, #tpu.memory_space<vmem>>, %arg5: memref<1x128xf32, #tpu.memory_space<vmem>>, %arg6: memref<16x128xf32, #tpu.memory_space<vmem>>, %arg7: memref<16x128xf32, #tpu.memory_space<vmem>>) attributes {dimension_semantics = [#tpu.dimension_semantics<parallel>], iteration_bounds = array<i64: 1>, scalar_prefetch = 0 : i64, scratch_operands = 0 : i64, tpu.core_type = #tpu.core_type<tc>, window_params = [{transform_indices = @transform_0, window_bounds = array<i64: 16, 16>}, {pipeline_mode = #tpu.pipeline_mode<synchronous>, transform_indices = @transform_1, window_bounds = array<i64: 16, 128>}, {pipeline_mode = #tpu.pipeline_mode<synchronous>, transform_indices = @transform_2, window_bounds = array<i64: 16, 128>}, {pipeline_mode = #tpu.pipeline_mode<synchronous>, transform_indices = @transform_3, window_bounds = array<i64: 1, 128>}, {pipeline_mode = #tpu.pipeline_mode<synchronous>, transform_indices = @transform_4, window_bounds = array<i64: 1, 128>}, {transform_indices = @transform_5, window_bounds = array<i64: 16, 128>}, {transform_indices = @transform_6, window_bounds = array<i64: 16, 128>}]} {
    %c0 = arith.constant 0 : index
    %c0_0 = arith.constant 0 : index
    %0 = vector.load %arg1[%c0, %c0_0] : memref<16x16xbf16, #tpu.memory_space<vmem>>, vector<16x16xbf16>
    %c0_1 = arith.constant 0 : index
    %c0_2 = arith.constant 0 : index
    %1 = vector.load %arg2[%c0_1, %c0_2] : memref<16x128xbf16, #tpu.memory_space<vmem>>, vector<16x128xbf16>
    %cst = arith.constant dense<0.000000e+00> : vector<16x128xf32>
    %2 = tpu.matmul %0, %1, %cst {dimension_numbers = #tpu.dot_dimension_numbers<[1], [0], [0], [1], [0, 0, 1, 1], [], []>} : vector<16x16xbf16>, vector<16x128xbf16>, vector<16x128xf32> -> vector<16x128xf32>
    %c0_3 = arith.constant 0 : index
    %c0_4 = arith.constant 0 : index
    %3 = vector.load %arg4[%c0_3, %c0_4] : memref<1x128xf32, #tpu.memory_space<vmem>>, vector<1x128xf32>
    %4 = vector.broadcast %3 : vector<1x128xf32> to vector<16x128xf32>
    %5 = arith.addf %2, %4 : vector<16x128xf32>
    %c0_5 = arith.constant 0 : index
    %c0_6 = arith.constant 0 : index
    %6 = vector.load %arg6[%c0_5, %c0_6] : memref<16x128xf32, #tpu.memory_space<vmem>>, vector<16x128xf32>
    tpu.vector_store %arg6[%c0_5, %c0_6], %5 {strides = array<i32>} : memref<16x128xf32, #tpu.memory_space<vmem>>, vector<16x128xf32>,
    %c0_7 = arith.constant 0 : index
    %c0_8 = arith.constant 0 : index
    %7 = vector.load %arg3[%c0_7, %c0_8] : memref<16x128xbf16, #tpu.memory_space<vmem>>, vector<16x128xbf16>
    %cst_9 = arith.constant dense<0.000000e+00> : vector<16x128xf32>
    %8 = tpu.matmul %0, %7, %cst_9 {dimension_numbers = #tpu.dot_dimension_numbers<[1], [0], [0], [1], [0, 0, 1, 1], [], []>} : vector<16x16xbf16>, vector<16x128xbf16>, vector<16x128xf32> -> vector<16x128xf32>
    %c0_10 = arith.constant 0 : index
    %c0_11 = arith.constant 0 : index
    %9 = vector.load %arg5[%c0_10, %c0_11] : memref<1x128xf32, #tpu.memory_space<vmem>>, vector<1x128xf32>
    %10 = vector.broadcast %9 : vector<1x128xf32> to vector<16x128xf32>
    %11 = arith.addf %8, %10 : vector<16x128xf32>
    %c0_12 = arith.constant 0 : index
    %c0_13 = arith.constant 0 : index
    %12 = vector.load %arg7[%c0_12, %c0_13] : memref<16x128xf32, #tpu.memory_space<vmem>>, vector<16x128xf32>
    tpu.vector_store %arg7[%c0_12, %c0_13], %11 {strides = array<i32>} : memref<16x128xf32, #tpu.memory_space<vmem>>, vector<16x128xf32>,
    return
  }
  func.func @transform_0(%arg0: i32) -> (i32, i32) {
    %c0_i32 = arith.constant 0 : i32
    %c0_i32_0 = arith.constant 0 : i32
    return %arg0, %c0_i32 : i32, i32
  }
  func.func @transform_1(%arg0: i32) -> (i32, i32) {
    %c0_i32 = arith.constant 0 : i32
    %c0_i32_0 = arith.constant 0 : i32
    %c0_i32_1 = arith.constant 0 : i32
    return %c0_i32, %c0_i32_0 : i32, i32
  }
  func.func @transform_2(%arg0: i32) -> (i32, i32) {
    %c0_i32 = arith.constant 0 : i32
    %c0_i32_0 = arith.constant 0 : i32
    %c0_i32_1 = arith.constant 0 : i32
    return %c0_i32, %c0_i32_0 : i32, i32
  }
  func.func @transform_3(%arg0: i32) -> (i32, i32) {
    %c0_i32 = arith.constant 0 : i32
    %c0_i32_0 = arith.constant 0 : i32
    %c0_i32_1 = arith.constant 0 : i32
    return %c0_i32, %c0_i32_0 : i32, i32
  }
  func.func @transform_4(%arg0: i32) -> (i32, i32) {
    %c0_i32 = arith.constant 0 : i32
    %c0_i32_0 = arith.constant 0 : i32
    %c0_i32_1 = arith.constant 0 : i32
    return %c0_i32, %c0_i32_0 : i32, i32
  }
  func.func @transform_5(%arg0: i32) -> (i32, i32) {
    %c0_i32 = arith.constant 0 : i32
    %c0_i32_0 = arith.constant 0 : i32
    return %arg0, %c0_i32 : i32, i32
  }
  func.func @transform_6(%arg0: i32) -> (i32, i32) {
    %c0_i32 = arith.constant 0 : i32
    %c0_i32_0 = arith.constant 0 : i32
    return %arg0, %c0_i32 : i32, i32
  }
}

module attributes {stable_mosaic.version = 11 : i64} {
  func.func @bilstm_recurrence_kernel(%arg0: i32, %arg1: memref<1x2x128xf32, #tpu.memory_space<vmem>>, %arg2: memref<1x2x128xf32, #tpu.memory_space<vmem>>, %arg3: memref<32x128xbf16, #tpu.memory_space<any>>, %arg4: memref<32x128xbf16, #tpu.memory_space<any>>, %arg5: memref<8x2x32xf32, #tpu.memory_space<vmem>>, %arg6: memref<8x2x32xf32, #tpu.memory_space<vmem>>, %arg7: memref<32x128xbf16, #tpu.memory_space<vmem>>, %arg8: memref<32x128xbf16, #tpu.memory_space<vmem>>, %arg9: memref<2x32xf32, #tpu.memory_space<vmem>>, %arg10: memref<2x32xf32, #tpu.memory_space<vmem>>, %arg11: memref<2x32xf32, #tpu.memory_space<vmem>>, %arg12: memref<2x32xf32, #tpu.memory_space<vmem>>, %arg13: memref<2x!tpu.dma_semaphore, #tpu.memory_space<semaphore_mem>>) attributes {dimension_semantics = [#tpu.dimension_semantics<arbitrary>], iteration_bounds = array<i64: 8>, scalar_prefetch = 0 : i64, scratch_operands = 7 : i64, tpu.core_type = #tpu.core_type<tc>, window_params = [{transform_indices = @transform_0, window_bounds = array<i64: 1, 2, 128>}, {transform_indices = @transform_1, window_bounds = array<i64: 1, 2, 128>}, {}, {}, {pipeline_mode = #tpu.pipeline_mode<synchronous>, transform_indices = @transform_4, window_bounds = array<i64: 8, 2, 32>}, {pipeline_mode = #tpu.pipeline_mode<synchronous>, transform_indices = @transform_5, window_bounds = array<i64: 8, 2, 32>}]} {
    %c0_i32 = arith.constant 0 : i32
    %0 = arith.cmpi eq, %arg0, %c0_i32 : i32
    %1 = arith.extui %0 : i1 to i32
    %c0_i32_0 = arith.constant 0 : i32
    %2 = arith.cmpi ne, %1, %c0_i32_0 : i32
    scf.if %2 {
      %c0_i32_37 = arith.constant 0 : i32
      %82 = tpu.memref_slice %arg13[%c0_i32_37] : memref<2x!tpu.dma_semaphore, #tpu.memory_space<semaphore_mem>> -> memref<1x!tpu.dma_semaphore, #tpu.memory_space<semaphore_mem>>
      %83 = tpu.memref_squeeze %82 : memref<1x!tpu.dma_semaphore, #tpu.memory_space<semaphore_mem>> -> memref<!tpu.dma_semaphore, #tpu.memory_space<semaphore_mem>>
      tpu.enqueue_dma source(%arg3 : memref<32x128xbf16, #tpu.memory_space<any>>) target(%arg7 : memref<32x128xbf16, #tpu.memory_space<vmem>>) target_semaphore(%83 : memref<!tpu.dma_semaphore, #tpu.memory_space<semaphore_mem>>)
      %c1_i32 = arith.constant 1 : i32
      %84 = tpu.memref_slice %arg13[%c1_i32] : memref<2x!tpu.dma_semaphore, #tpu.memory_space<semaphore_mem>> -> memref<1x!tpu.dma_semaphore, #tpu.memory_space<semaphore_mem>>
      %85 = tpu.memref_squeeze %84 : memref<1x!tpu.dma_semaphore, #tpu.memory_space<semaphore_mem>> -> memref<!tpu.dma_semaphore, #tpu.memory_space<semaphore_mem>>
      tpu.enqueue_dma source(%arg4 : memref<32x128xbf16, #tpu.memory_space<any>>) target(%arg8 : memref<32x128xbf16, #tpu.memory_space<vmem>>) target_semaphore(%85 : memref<!tpu.dma_semaphore, #tpu.memory_space<semaphore_mem>>)
      %cst_38 = arith.constant 0.000000e+00 : f32
      %86 = vector.broadcast %cst_38 : f32 to vector<2x32xf32>
      %c0_39 = arith.constant 0 : index
      %c0_40 = arith.constant 0 : index
      %87 = vector.load %arg9[%c0_39, %c0_40] : memref<2x32xf32, #tpu.memory_space<vmem>>, vector<2x32xf32>
      tpu.vector_store %arg9[%c0_39, %c0_40], %86 {strides = array<i32>} : memref<2x32xf32, #tpu.memory_space<vmem>>, vector<2x32xf32>,
      %cst_41 = arith.constant 0.000000e+00 : f32
      %88 = vector.broadcast %cst_41 : f32 to vector<2x32xf32>
      %c0_42 = arith.constant 0 : index
      %c0_43 = arith.constant 0 : index
      %89 = vector.load %arg10[%c0_42, %c0_43] : memref<2x32xf32, #tpu.memory_space<vmem>>, vector<2x32xf32>
      tpu.vector_store %arg10[%c0_42, %c0_43], %88 {strides = array<i32>} : memref<2x32xf32, #tpu.memory_space<vmem>>, vector<2x32xf32>,
      %cst_44 = arith.constant 0.000000e+00 : f32
      %90 = vector.broadcast %cst_44 : f32 to vector<2x32xf32>
      %c0_45 = arith.constant 0 : index
      %c0_46 = arith.constant 0 : index
      %91 = vector.load %arg11[%c0_45, %c0_46] : memref<2x32xf32, #tpu.memory_space<vmem>>, vector<2x32xf32>
      tpu.vector_store %arg11[%c0_45, %c0_46], %90 {strides = array<i32>} : memref<2x32xf32, #tpu.memory_space<vmem>>, vector<2x32xf32>,
      %cst_47 = arith.constant 0.000000e+00 : f32
      %92 = vector.broadcast %cst_47 : f32 to vector<2x32xf32>
      %c0_48 = arith.constant 0 : index
      %c0_49 = arith.constant 0 : index
      %93 = vector.load %arg12[%c0_48, %c0_49] : memref<2x32xf32, #tpu.memory_space<vmem>>, vector<2x32xf32>
      tpu.vector_store %arg12[%c0_48, %c0_49], %92 {strides = array<i32>} : memref<2x32xf32, #tpu.memory_space<vmem>>, vector<2x32xf32>,
      %c0_i32_50 = arith.constant 0 : i32
      %94 = tpu.memref_slice %arg13[%c0_i32_50] : memref<2x!tpu.dma_semaphore, #tpu.memory_space<semaphore_mem>> -> memref<1x!tpu.dma_semaphore, #tpu.memory_space<semaphore_mem>>
      %95 = tpu.memref_squeeze %94 : memref<1x!tpu.dma_semaphore, #tpu.memory_space<semaphore_mem>> -> memref<!tpu.dma_semaphore, #tpu.memory_space<semaphore_mem>>
      tpu.wait_dma2 semaphore(%95 : memref<!tpu.dma_semaphore, #tpu.memory_space<semaphore_mem>>) src(%arg3 : memref<32x128xbf16, #tpu.memory_space<any>>) dst(%arg7 : memref<32x128xbf16, #tpu.memory_space<vmem>>)
      %c1_i32_51 = arith.constant 1 : i32
      %96 = tpu.memref_slice %arg13[%c1_i32_51] : memref<2x!tpu.dma_semaphore, #tpu.memory_space<semaphore_mem>> -> memref<1x!tpu.dma_semaphore, #tpu.memory_space<semaphore_mem>>
      %97 = tpu.memref_squeeze %96 : memref<1x!tpu.dma_semaphore, #tpu.memory_space<semaphore_mem>> -> memref<!tpu.dma_semaphore, #tpu.memory_space<semaphore_mem>>
      tpu.wait_dma2 semaphore(%97 : memref<!tpu.dma_semaphore, #tpu.memory_space<semaphore_mem>>) src(%arg4 : memref<32x128xbf16, #tpu.memory_space<any>>) dst(%arg8 : memref<32x128xbf16, #tpu.memory_space<vmem>>)
    } else {
    }
    %c0 = arith.constant 0 : index
    %c0_1 = arith.constant 0 : index
    %c0_2 = arith.constant 0 : index
    %3 = vector.load %arg1[%c0, %c0_1, %c0_2] : memref<1x2x128xf32, #tpu.memory_space<vmem>>, vector<1x2x128xf32>
    %4 = vector.shape_cast %3 : vector<1x2x128xf32> to vector<2x128xf32>
    %c0_3 = arith.constant 0 : index
    %c0_4 = arith.constant 0 : index
    %5 = vector.load %arg9[%c0_3, %c0_4] : memref<2x32xf32, #tpu.memory_space<vmem>>, vector<2x32xf32>
    %6 = arith.truncf %5 : vector<2x32xf32> to vector<2x32xbf16>
    %c0_5 = arith.constant 0 : index
    %c0_6 = arith.constant 0 : index
    %7 = vector.load %arg7[%c0_5, %c0_6] : memref<32x128xbf16, #tpu.memory_space<vmem>>, vector<32x128xbf16>
    %cst = arith.constant dense<0.000000e+00> : vector<2x128xf32>
    %8 = tpu.matmul %6, %7, %cst {dimension_numbers = #tpu.dot_dimension_numbers<[1], [0], [0], [1], [0, 0, 1, 1], [], []>} : vector<2x32xbf16>, vector<32x128xbf16>, vector<2x128xf32> -> vector<2x128xf32>
    %9 = arith.addf %4, %8 : vector<2x128xf32>
    %c0_7 = arith.constant 0 : index
    %c0_8 = arith.constant 0 : index
    %c0_9 = arith.constant 0 : index
    %10 = vector.load %arg2[%c0_7, %c0_8, %c0_9] : memref<1x2x128xf32, #tpu.memory_space<vmem>>, vector<1x2x128xf32>
    %11 = vector.shape_cast %10 : vector<1x2x128xf32> to vector<2x128xf32>
    %c0_10 = arith.constant 0 : index
    %c0_11 = arith.constant 0 : index
    %12 = vector.load %arg11[%c0_10, %c0_11] : memref<2x32xf32, #tpu.memory_space<vmem>>, vector<2x32xf32>
    %13 = arith.truncf %12 : vector<2x32xf32> to vector<2x32xbf16>
    %c0_12 = arith.constant 0 : index
    %c0_13 = arith.constant 0 : index
    %14 = vector.load %arg8[%c0_12, %c0_13] : memref<32x128xbf16, #tpu.memory_space<vmem>>, vector<32x128xbf16>
    %cst_14 = arith.constant dense<0.000000e+00> : vector<2x128xf32>
    %15 = tpu.matmul %13, %14, %cst_14 {dimension_numbers = #tpu.dot_dimension_numbers<[1], [0], [0], [1], [0, 0, 1, 1], [], []>} : vector<2x32xbf16>, vector<32x128xbf16>, vector<2x128xf32> -> vector<2x128xf32>
    %16 = arith.addf %11, %15 : vector<2x128xf32>
    %c0_15 = arith.constant 0 : index
    %c0_16 = arith.constant 0 : index
    %17 = vector.load %arg10[%c0_15, %c0_16] : memref<2x32xf32, #tpu.memory_space<vmem>>, vector<2x32xf32>
    %18 = vector.extract_strided_slice %9 {offsets = [0, 0], sizes = [2, 32], strides = [1, 1]} : vector<2x128xf32> to vector<2x32xf32>
    %19 = arith.negf %18 : vector<2x32xf32>
    %20 = math.exp %19 : vector<2x32xf32>
    %cst_17 = arith.constant 1.000000e+00 : f32
    %21 = vector.broadcast %cst_17 : f32 to vector<2x32xf32>
    %22 = arith.addf %21, %20 : vector<2x32xf32>
    %23 = arith.divf %21, %22 : vector<2x32xf32>
    %24 = vector.extract_strided_slice %9 {offsets = [0, 32], sizes = [2, 32], strides = [1, 1]} : vector<2x128xf32> to vector<2x32xf32>
    %25 = arith.negf %24 : vector<2x32xf32>
    %26 = math.exp %25 : vector<2x32xf32>
    %cst_18 = arith.constant 1.000000e+00 : f32
    %27 = vector.broadcast %cst_18 : f32 to vector<2x32xf32>
    %28 = arith.addf %27, %26 : vector<2x32xf32>
    %29 = arith.divf %27, %28 : vector<2x32xf32>
    %30 = vector.extract_strided_slice %9 {offsets = [0, 64], sizes = [2, 32], strides = [1, 1]} : vector<2x128xf32> to vector<2x32xf32>
    %31 = math.tanh %30 : vector<2x32xf32>
    %32 = vector.extract_strided_slice %9 {offsets = [0, 96], sizes = [2, 32], strides = [1, 1]} : vector<2x128xf32> to vector<2x32xf32>
    %33 = arith.negf %32 : vector<2x32xf32>
    %34 = math.exp %33 : vector<2x32xf32>
    %cst_19 = arith.constant 1.000000e+00 : f32
    %35 = vector.broadcast %cst_19 : f32 to vector<2x32xf32>
    %36 = arith.addf %35, %34 : vector<2x32xf32>
    %37 = arith.divf %35, %36 : vector<2x32xf32>
    %38 = arith.mulf %29, %17 : vector<2x32xf32>
    %39 = arith.mulf %23, %31 : vector<2x32xf32>
    %40 = arith.addf %38, %39 : vector<2x32xf32>
    %41 = math.tanh %40 : vector<2x32xf32>
    %42 = arith.mulf %37, %41 : vector<2x32xf32>
    %c0_20 = arith.constant 0 : index
    %c0_21 = arith.constant 0 : index
    %43 = vector.load %arg12[%c0_20, %c0_21] : memref<2x32xf32, #tpu.memory_space<vmem>>, vector<2x32xf32>
    %44 = vector.extract_strided_slice %16 {offsets = [0, 0], sizes = [2, 32], strides = [1, 1]} : vector<2x128xf32> to vector<2x32xf32>
    %45 = arith.negf %44 : vector<2x32xf32>
    %46 = math.exp %45 : vector<2x32xf32>
    %cst_22 = arith.constant 1.000000e+00 : f32
    %47 = vector.broadcast %cst_22 : f32 to vector<2x32xf32>
    %48 = arith.addf %47, %46 : vector<2x32xf32>
    %49 = arith.divf %47, %48 : vector<2x32xf32>
    %50 = vector.extract_strided_slice %16 {offsets = [0, 32], sizes = [2, 32], strides = [1, 1]} : vector<2x128xf32> to vector<2x32xf32>
    %51 = arith.negf %50 : vector<2x32xf32>
    %52 = math.exp %51 : vector<2x32xf32>
    %cst_23 = arith.constant 1.000000e+00 : f32
    %53 = vector.broadcast %cst_23 : f32 to vector<2x32xf32>
    %54 = arith.addf %53, %52 : vector<2x32xf32>
    %55 = arith.divf %53, %54 : vector<2x32xf32>
    %56 = vector.extract_strided_slice %16 {offsets = [0, 64], sizes = [2, 32], strides = [1, 1]} : vector<2x128xf32> to vector<2x32xf32>
    %57 = math.tanh %56 : vector<2x32xf32>
    %58 = vector.extract_strided_slice %16 {offsets = [0, 96], sizes = [2, 32], strides = [1, 1]} : vector<2x128xf32> to vector<2x32xf32>
    %59 = arith.negf %58 : vector<2x32xf32>
    %60 = math.exp %59 : vector<2x32xf32>
    %cst_24 = arith.constant 1.000000e+00 : f32
    %61 = vector.broadcast %cst_24 : f32 to vector<2x32xf32>
    %62 = arith.addf %61, %60 : vector<2x32xf32>
    %63 = arith.divf %61, %62 : vector<2x32xf32>
    %64 = arith.mulf %55, %43 : vector<2x32xf32>
    %65 = arith.mulf %49, %57 : vector<2x32xf32>
    %66 = arith.addf %64, %65 : vector<2x32xf32>
    %67 = math.tanh %66 : vector<2x32xf32>
    %68 = arith.mulf %63, %67 : vector<2x32xf32>
    %c0_25 = arith.constant 0 : index
    %c0_26 = arith.constant 0 : index
    %69 = vector.load %arg9[%c0_25, %c0_26] : memref<2x32xf32, #tpu.memory_space<vmem>>, vector<2x32xf32>
    tpu.vector_store %arg9[%c0_25, %c0_26], %42 {strides = array<i32>} : memref<2x32xf32, #tpu.memory_space<vmem>>, vector<2x32xf32>,
    %c0_27 = arith.constant 0 : index
    %c0_28 = arith.constant 0 : index
    %70 = vector.load %arg10[%c0_27, %c0_28] : memref<2x32xf32, #tpu.memory_space<vmem>>, vector<2x32xf32>
    tpu.vector_store %arg10[%c0_27, %c0_28], %40 {strides = array<i32>} : memref<2x32xf32, #tpu.memory_space<vmem>>, vector<2x32xf32>,
    %c0_29 = arith.constant 0 : index
    %c0_30 = arith.constant 0 : index
    %71 = vector.load %arg11[%c0_29, %c0_30] : memref<2x32xf32, #tpu.memory_space<vmem>>, vector<2x32xf32>
    tpu.vector_store %arg11[%c0_29, %c0_30], %68 {strides = array<i32>} : memref<2x32xf32, #tpu.memory_space<vmem>>, vector<2x32xf32>,
    %c0_31 = arith.constant 0 : index
    %c0_32 = arith.constant 0 : index
    %72 = vector.load %arg12[%c0_31, %c0_32] : memref<2x32xf32, #tpu.memory_space<vmem>>, vector<2x32xf32>
    tpu.vector_store %arg12[%c0_31, %c0_32], %66 {strides = array<i32>} : memref<2x32xf32, #tpu.memory_space<vmem>>, vector<2x32xf32>,
    %73 = arith.index_cast %arg0 : i32 to index
    %c0_33 = arith.constant 0 : index
    %c0_34 = arith.constant 0 : index
    %74 = vector.load %arg5[%73, %c0_33, %c0_34] : memref<8x2x32xf32, #tpu.memory_space<vmem>>, vector<1x2x32xf32>
    %75 = vector.shape_cast %74 : vector<1x2x32xf32> to vector<2x32xf32>
    %76 = vector.shape_cast %42 : vector<2x32xf32> to vector<1x2x32xf32>
    tpu.vector_store %arg5[%73, %c0_33, %c0_34], %76 {strides = array<i32>} : memref<8x2x32xf32, #tpu.memory_space<vmem>>, vector<1x2x32xf32>,
    %c7_i32 = arith.constant 7 : i32
    %77 = arith.subi %c7_i32, %arg0 : i32
    %78 = arith.index_cast %77 : i32 to index
    %c0_35 = arith.constant 0 : index
    %c0_36 = arith.constant 0 : index
    %79 = vector.load %arg6[%78, %c0_35, %c0_36] : memref<8x2x32xf32, #tpu.memory_space<vmem>>, vector<1x2x32xf32>
    %80 = vector.shape_cast %79 : vector<1x2x32xf32> to vector<2x32xf32>
    %81 = vector.shape_cast %68 : vector<2x32xf32> to vector<1x2x32xf32>
    tpu.vector_store %arg6[%78, %c0_35, %c0_36], %81 {strides = array<i32>} : memref<8x2x32xf32, #tpu.memory_space<vmem>>, vector<1x2x32xf32>,
    return
  }
  func.func @transform_0(%arg0: i32) -> (i32, i32, i32) {
    %c0_i32 = arith.constant 0 : i32
    %c0_i32_0 = arith.constant 0 : i32
    %c0_i32_1 = arith.constant 0 : i32
    return %arg0, %c0_i32, %c0_i32_0 : i32, i32, i32
  }
  func.func @transform_1(%arg0: i32) -> (i32, i32, i32) {
    %c7_i32 = arith.constant 7 : i32
    %0 = arith.subi %c7_i32, %arg0 : i32
    %c0_i32 = arith.constant 0 : i32
    %c0_i32_0 = arith.constant 0 : i32
    %c0_i32_1 = arith.constant 0 : i32
    return %0, %c0_i32, %c0_i32_0 : i32, i32, i32
  }
  func.func @transform_4(%arg0: i32) -> (i32, i32, i32) {
    %c0_i32 = arith.constant 0 : i32
    %c0_i32_0 = arith.constant 0 : i32
    %c0_i32_1 = arith.constant 0 : i32
    %c0_i32_2 = arith.constant 0 : i32
    return %c0_i32, %c0_i32_0, %c0_i32_1 : i32, i32, i32
  }
  func.func @transform_5(%arg0: i32) -> (i32, i32, i32) {
    %c0_i32 = arith.constant 0 : i32
    %c0_i32_0 = arith.constant 0 : i32
    %c0_i32_1 = arith.constant 0 : i32
    %c0_i32_2 = arith.constant 0 : i32
    return %c0_i32, %c0_i32_0, %c0_i32_1 : i32, i32, i32
  }
}

module attributes {stable_mosaic.version = 11 : i64} {
  func.func @dual_linear_kernel(%arg0: i32, %arg1: memref<16x32xf32, #tpu.memory_space<vmem>>, %arg2: memref<16x32xf32, #tpu.memory_space<vmem>>, %arg3: memref<32x32xbf16, #tpu.memory_space<vmem>>, %arg4: memref<32x32xbf16, #tpu.memory_space<vmem>>, %arg5: memref<1x32xf32, #tpu.memory_space<vmem>>, %arg6: memref<16x32xf32, #tpu.memory_space<vmem>>) attributes {dimension_semantics = [#tpu.dimension_semantics<parallel>], iteration_bounds = array<i64: 1>, scalar_prefetch = 0 : i64, scratch_operands = 0 : i64, tpu.core_type = #tpu.core_type<tc>, window_params = [{transform_indices = @transform_0, window_bounds = array<i64: 16, 32>}, {transform_indices = @transform_1, window_bounds = array<i64: 16, 32>}, {pipeline_mode = #tpu.pipeline_mode<synchronous>, transform_indices = @transform_2, window_bounds = array<i64: 32, 32>}, {pipeline_mode = #tpu.pipeline_mode<synchronous>, transform_indices = @transform_3, window_bounds = array<i64: 32, 32>}, {pipeline_mode = #tpu.pipeline_mode<synchronous>, transform_indices = @transform_4, window_bounds = array<i64: 1, 32>}, {transform_indices = @transform_5, window_bounds = array<i64: 16, 32>}]} {
    %c0 = arith.constant 0 : index
    %c0_0 = arith.constant 0 : index
    %0 = vector.load %arg1[%c0, %c0_0] : memref<16x32xf32, #tpu.memory_space<vmem>>, vector<16x32xf32>
    %1 = arith.truncf %0 : vector<16x32xf32> to vector<16x32xbf16>
    %c0_1 = arith.constant 0 : index
    %c0_2 = arith.constant 0 : index
    %2 = vector.load %arg3[%c0_1, %c0_2] : memref<32x32xbf16, #tpu.memory_space<vmem>>, vector<32x32xbf16>
    %cst = arith.constant dense<0.000000e+00> : vector<16x32xf32>
    %3 = tpu.matmul %1, %2, %cst {dimension_numbers = #tpu.dot_dimension_numbers<[1], [0], [0], [1], [0, 0, 1, 1], [], []>} : vector<16x32xbf16>, vector<32x32xbf16>, vector<16x32xf32> -> vector<16x32xf32>
    %c0_3 = arith.constant 0 : index
    %c0_4 = arith.constant 0 : index
    %4 = vector.load %arg2[%c0_3, %c0_4] : memref<16x32xf32, #tpu.memory_space<vmem>>, vector<16x32xf32>
    %5 = arith.truncf %4 : vector<16x32xf32> to vector<16x32xbf16>
    %c0_5 = arith.constant 0 : index
    %c0_6 = arith.constant 0 : index
    %6 = vector.load %arg4[%c0_5, %c0_6] : memref<32x32xbf16, #tpu.memory_space<vmem>>, vector<32x32xbf16>
    %cst_7 = arith.constant dense<0.000000e+00> : vector<16x32xf32>
    %7 = tpu.matmul %5, %6, %cst_7 {dimension_numbers = #tpu.dot_dimension_numbers<[1], [0], [0], [1], [0, 0, 1, 1], [], []>} : vector<16x32xbf16>, vector<32x32xbf16>, vector<16x32xf32> -> vector<16x32xf32>
    %8 = arith.addf %3, %7 : vector<16x32xf32>
    %c0_8 = arith.constant 0 : index
    %c0_9 = arith.constant 0 : index
    %9 = vector.load %arg5[%c0_8, %c0_9] : memref<1x32xf32, #tpu.memory_space<vmem>>, vector<1x32xf32>
    %10 = vector.broadcast %9 : vector<1x32xf32> to vector<16x32xf32>
    %11 = arith.addf %8, %10 : vector<16x32xf32>
    %c0_10 = arith.constant 0 : index
    %c0_11 = arith.constant 0 : index
    %12 = vector.load %arg6[%c0_10, %c0_11] : memref<16x32xf32, #tpu.memory_space<vmem>>, vector<16x32xf32>
    tpu.vector_store %arg6[%c0_10, %c0_11], %11 {strides = array<i32>} : memref<16x32xf32, #tpu.memory_space<vmem>>, vector<16x32xf32>,
    return
  }
  func.func @transform_0(%arg0: i32) -> (i32, i32) {
    %c0_i32 = arith.constant 0 : i32
    %c0_i32_0 = arith.constant 0 : i32
    return %arg0, %c0_i32 : i32, i32
  }
  func.func @transform_1(%arg0: i32) -> (i32, i32) {
    %c0_i32 = arith.constant 0 : i32
    %c0_i32_0 = arith.constant 0 : i32
    return %arg0, %c0_i32 : i32, i32
  }
  func.func @transform_2(%arg0: i32) -> (i32, i32) {
    %c0_i32 = arith.constant 0 : i32
    %c0_i32_0 = arith.constant 0 : i32
    %c0_i32_1 = arith.constant 0 : i32
    return %c0_i32, %c0_i32_0 : i32, i32
  }
  func.func @transform_3(%arg0: i32) -> (i32, i32) {
    %c0_i32 = arith.constant 0 : i32
    %c0_i32_0 = arith.constant 0 : i32
    %c0_i32_1 = arith.constant 0 : i32
    return %c0_i32, %c0_i32_0 : i32, i32
  }
  func.func @transform_4(%arg0: i32) -> (i32, i32) {
    %c0_i32 = arith.constant 0 : i32
    %c0_i32_0 = arith.constant 0 : i32
    %c0_i32_1 = arith.constant 0 : i32
    return %c0_i32, %c0_i32_0 : i32, i32
  }
  func.func @transform_5(%arg0: i32) -> (i32, i32) {
    %c0_i32 = arith.constant 0 : i32
    %c0_i32_0 = arith.constant 0 : i32
    return %arg0, %c0_i32 : i32, i32
  }
}

</mosaic_0001>

<bundles_post_ra>
// kernel: bidirectional_lstm.3
= control target key start
LH: loop header
LB: loop body
LE: loop exit
PB: predicated region body
PF: predicated region fallthrough
CT: control target
= control target key end

     0   :  { %12 = vsyncpa [#allocation3], 0  ;;  %s355_s0 = inlined_call_operand.vmem [shape: bf16[16,16], index: 0, kind: input, shape index: {}]   ;;  %s356_s1 = inlined_call_operand.hbm [shape: bf16[16,128], index: 1, kind: input, shape index: {}]   ;;  %s357_s2 = inlined_call_operand.hbm [shape: bf16[16,128], index: 2, kind: input, shape index: {}]   ;;  %s358_s3 = inlined_call_operand.hbm [shape: f32[1,128], index: 3, kind: input, shape index: {}]   ;;  %s359_s4 = inlined_call_operand.hbm [shape: f32[1,128], index: 4, kind: input, shape index: {}]   ;;  %s360_s5 = inlined_call_operand.vmem [shape: f32[16,128], index: 5, kind: output, shape index: {0}]   ;;  %s361_s6 = inlined_call_operand.vmem [shape: f32[16,128], index: 6, kind: output, shape index: {1}]  }
   0x1   :  { %13 = vsyncpa [#allocation5], 0 }
   0x2   :  { %14 = vsyncpa [#allocation8], 0  ;;  %s34_s23 = sshll.u32 %s357_s2, 4  ;;  %s287_s24 = smov [#allocation4]   ;;  %s35_s23 = int_to_ptr.hbm [resolvable:$true] %s34_s23 }
   0x3   :  { %s36_s25 = sshll.u32 %s287_s24, 4  ;;  %s21_s28 = sshll.u32 %s356_s1, 4  ;;  %s37_s25 = int_to_ptr.vmem [resolvable:$true] %s36_s25  ;;  %s22_s28 = int_to_ptr.hbm [resolvable:$true] %s21_s28 }
   0x4   :  { %s288_s29 = smov 64   ;;  %s289_s30 = smov 4  }
   0x5   :  { %42 = dma.hbm_to_vmem [thread:$0]  %s35_s23, 128, %s37_s25, [#allocation5], %s288_s29, %s288_s29, %s289_s30  }
   0x6   :  { %s290_s7 = smov [#allocation2]   ;;  %s48_s11 = sshll.u32 %s358_s3, 4  ;;  %s49_s11 = int_to_ptr.hbm [resolvable:$true] %s48_s11 }
   0x7   :  { %s23_s8 = sshll.u32 %s290_s7, 4  ;;  %s59_s13 = sshll.u32 %s359_s4, 4  ;;  %s24_s8 = int_to_ptr.vmem [resolvable:$true] %s23_s8  ;;  %s60_s13 = int_to_ptr.hbm [resolvable:$true] %s59_s13 }
   0x8   :  { %29 = dma.hbm_to_vmem [thread:$0]  %s22_s28, 128, %s24_s8, [#allocation3], %s288_s29, %s288_s29, %s289_s30  }
   0x9   :  { %s291_s14 = smov [#allocation6]   ;;  %s292_s1 = smov [#allocation7]  }
   0xa   :  { %s50_s15 = sshll.u32 %s291_s14, 4  ;;  %s61_s16 = sshll.u32 %s292_s1, 4  ;;  %s51_s15 = int_to_ptr.vmem [resolvable:$true] %s50_s15  ;;  %s62_s16 = int_to_ptr.vmem [resolvable:$true] %s61_s16 }
   0xb   :  { %53 = dma.hbm_to_vmem [thread:$0]  %s49_s11, 16, %s51_s15, [#allocation5]  }
   0xc   :  { %64 = dma.hbm_to_vmem [thread:$0]  %s60_s13, 16, %s62_s16, [#allocation8]  }
   0xd   :  { %281 = dma.done.wait [#allocation3], 128  }
   0xe   :  { %282 = vsyncadd [#allocation3], 4294967168 }
   0xf   :  { %283 = dma.done.wait [#allocation5], 144  }
  0x10   :  { %284 = vsyncadd [#allocation5], 4294967152 }
  0x11   :  { %285 = dma.done.wait [#allocation8], 16  }
  0x12   :  { %286 = vsyncadd [#allocation8], 4294967280  ;;  %v175_v0 = vld [vmem:[#allocation2] sm:$0xff]  ;;  %v176_v1 = vld [vmem:[#allocation4] sm:$0xff]  ;;  %vm101_vm0 = vcmask 130048  }
  0x13   :  { %v174_v2 = vld [vmem:[%s355_s0] sm:$0xff]  ;;  %112 = vmatpush.bf16.msra.mxu0 %v175_v0  ;;  %140 = vmatpush.bf16.msra.mxu1 %v176_v1  ;;  %v183_v3 = vld [vmem:[#allocation6] ss:$0 sm:$0xff]  ;;  %v184_v4 = vld [vmem:[#allocation7] ss:$0 sm:$0xff] }
  0x16   :  { %168 = vmatmul.msk.bf16.vlgmr.msra.gmra.mxu0 %vm101_vm0, %v174_v2  ;;  %173 = vmatmul.msk.bf16.vlgmr.msra.gmra.mxu1 %vm101_vm0, %v174_v2 }
  0x93   :  { %v114_v5 = vpop.f32.mrf.mxu0  ;;  %v142_v6 = vpop.f32.mrf.mxu1 }
  0x94   :  { %v115_v7 = vadd.f32 %v183_v3, %v114_v5  ;;  %v143_v8 = vadd.f32 %v184_v4, %v142_v6 }
  0x96   :  { %119 = vst [vmem:[%s360_s5] sm:$0xff] %v115_v7 }
  0x97   :  { %147 = vst [vmem:[%s361_s6] sm:$0xff] %v143_v8 }
  0x9b   :  { %v116_v9 = vpop.f32.mrf.mxu0  ;;  %v144_v10 = vpop.f32.mrf.mxu1 }
  0x9c   :  { %v117_v11 = vadd.f32 %v183_v3, %v116_v9  ;;  %v145_v12 = vadd.f32 %v184_v4, %v144_v10 }
  0x9e   :  { %120 = vst [vmem:[%s360_s5 + $0x8] sm:$0xff] %v117_v11 }
  0x9f   :  { %148 = vst [vmem:[%s361_s6 + $0x8] sm:$0xff] %v145_v12 }
  0xa0   :  { %157 = vsyncpa [#allocation3], 1 }
  0xa1   :  { %158 = vsyncpa [#allocation5], 1 }
  0xa2   :  { %159 = vsyncpa [#allocation8], 1 }

// kernel: bidirectional_lstm.5
= control target key start
LH: loop header
LB: loop body
LE: loop exit
PB: predicated region body
PF: predicated region fallthrough
CT: control target
= control target key end

     0   :  { %10 = vsyncpa [#allocation3], 0  ;;  %s175_s21 = smov [#allocation2]   ;;  %s176_s23 = smov 64   ;;  %s238_s0 = inlined_call_operand.vmem [shape: f32[16,32], index: 0, kind: input, shape index: {}]   ;;  %s239_s1 = inlined_call_operand.vmem [shape: f32[16,32], index: 1, kind: input, shape index: {}]   ;;  %s240_s2 = inlined_call_operand.vmem [shape: bf16[32,32], index: 2, kind: input, shape index: {}]   ;;  %s241_s3 = inlined_call_operand.hbm [shape: bf16[32,32], index: 3, kind: input, shape index: {}]   ;;  %s242_s4 = inlined_call_operand.vmem [shape: f32[1,32], index: 4, kind: input, shape index: {}]   ;;  %s243_s5 = inlined_call_operand.vmem [shape: f32[16,32], index: 5, kind: output, shape index: {}]  }
   0x1   :  { %s21_s20 = sshll.u32 %s241_s3, 4  ;;  %s23_s22 = sshll.u32 %s175_s21, 4  ;;  %s22_s20 = int_to_ptr.hbm [resolvable:$true] %s21_s20  ;;  %s24_s22 = int_to_ptr.vmem [resolvable:$true] %s23_s22 }
   0x2   :  { %s177_s24 = smov 4  }
   0x3   :  { %29 = dma.hbm_to_vmem [thread:$0]  %s22_s20, 256, %s24_s22, [#allocation3], %s176_s23, %s176_s23, %s177_s24  }
   0x4   :  { %173 = dma.done.wait [#allocation3], 256  }
   0x5   :  { %174 = vsyncadd [#allocation3], 4294967040  ;;  %v144_v0 = vld [vmem:[#allocation2 + $0x8] sm:$0xff]  ;;  %v143_v2 = vld [vmem:[#allocation2] sm:$0xff]  ;;  %vm63_vm0 = vcmask 261120  }
   0x6   :  { %v142_v1 = vld [vmem:[%s240_s2 + $0x8] sm:$0xff]  ;;  %v141_v3 = vld [vmem:[%s240_s2] sm:$0xff]  ;;  %73 = vmatpush.bf16.msra.mxu0 %v144_v0 }
   0x7   :  { %v44_v4 = vld [vmem:[%s239_s1] sm:$0xff]  ;;  %v45_v5 = vld [vmem:[%s239_s1 + $0x8] sm:$0xff]  ;;  %102 = vmatpush.bf16.msra.mxu1 %v142_v1 }
   0x8   :  { %v37_v6 = vld [vmem:[%s238_s0] sm:$0xff]  ;;  %v38_v7 = vld [vmem:[%s238_s0 + $0x8] sm:$0xff]  ;;  %v46_v8 = vpack.c.bf16 %v45_v5, %v44_v4 }
   0x9   :  { %v39_v9 = vpack.c.bf16 %v38_v7, %v37_v6  ;;  %v148_v10 = vld [vmem:[%s242_s4] ss:$0 sm:$0xff] }
   0xa   :  { %74 = vmatpush.bf16.msra.mxu0 %v143_v2 }
   0xb   :  { %103 = vmatpush.bf16.msra.mxu1 %v141_v3 }
   0xd   :  { %131 = vmatmul.msk.bf16.vlgmr.msra.gmra.mxu0 %vm63_vm0, %v46_v8 }
   0xe   :  { %140 = vmatmul.msk.bf16.vlgmr.msra.gmra.mxu1 %vm63_vm0, %v39_v9 }
  0x8a   :  { %v76_v11 = vpop.f32.mrf.mxu0 }
  0x8b   :  { %v105_v12 = vpop.f32.mrf.mxu1 }
  0x8c   :  { %v106_v13 = vadd.f32 %v105_v12, %v76_v11 }
  0x8e   :  { %v114_v14 = vadd.f32 %v148_v10, %v106_v13 }
  0x90   :  { %116 = vst.msk [vmem:[%s243_s5] sm:$0xff] %vm63_vm0, %v114_v14 }
  0x92   :  { %v78_v15 = vpop.f32.mrf.mxu0 }
  0x93   :  { %v107_v16 = vpop.f32.mrf.mxu1 }
  0x94   :  { %v108_v17 = vadd.f32 %v107_v16, %v78_v15 }
  0x96   :  { %v115_v18 = vadd.f32 %v148_v10, %v108_v17 }
  0x98   :  { %117 = vst.msk [vmem:[%s243_s5 + $0x8] sm:$0xff] %vm63_vm0, %v115_v18 }
  0x99   :  { %122 = vsyncpa [#allocation3], 1 }

// kernel: bidirectional_lstm.4
= control target key start
LH: loop header
LB: loop body
LE: loop exit
PB: predicated region body
PF: predicated region fallthrough
CT: control target
= control target key end

     0   :  { %s601_s18 = smov 0   ;;  %s670_s0 = inlined_call_operand.vmem [shape: f32[8,2,128], index: 0, kind: input, shape index: {}]   ;;  %s671_s1 = inlined_call_operand.vmem [shape: f32[8,2,128], index: 1, kind: input, shape index: {}]   ;;  %s672_s2 = inlined_call_operand.vmem [shape: bf16[32,128], index: 2, kind: input, shape index: {}]   ;;  %s673_s3 = inlined_call_operand.vmem [shape: bf16[32,128], index: 3, kind: input, shape index: {}]   ;;  %s674_s4 = inlined_call_operand.vmem [shape: f32[8,2,32], index: 4, kind: output, shape index: {0}]   ;;  %s675_s5 = inlined_call_operand.vmem [shape: f32[8,2,32], index: 5, kind: output, shape index: {1}]  }
   0x1 LB: > { %s607_s19 = sadd.s32 4294967295, %s565_s18   ;;  %p493_p0 = scmp.ge.s32.totalorder %s565_s18, 1  ;;  %s565_s18 = sphi %s601_s18, %s16_s18  }
   0x2   : > { %p144_p1 = scmp.lt.s32.totalorder %s565_s18, 9 }
   0x4   : > { %p145_p2 = pnand %p493_p0, %p144_p1 }
   0x5   : > { %p167_p3 = scmp.lt.s32.totalorder (!%p145_p2), %s607_s19, 7  ;;  %s613_s20 = ssub.s32 (!%p145_p2), 7, %s607_s19 }
   0x6   : > { %148 = sbr.rel (%p145_p2) target bundleno = 635 (0x27b), region = 28  ;;  %p172_p4 = scmp.lt.s32.totalorder (!%p145_p2), %s613_s20, 7 }
   0x7   : > { %p496_p5 = scmp.ne.s32.totalorder (!%p145_p2), %s607_s19, 0 }
   0xb   : > { %s168_s21 = scalar_select %p167_p3, %s607_s19, 7 }
   0xc   : > { %s173_s22 = scalar_select %p172_p4, %s613_s20, 7 }
   0xd   : > { %s494_s23 = sshll.u32 %s168_s21, 1  ;;  %181 = sbr.rel (%p496_p5) target bundleno = 33 (0x21), region = 32 }
   0xe   : > { %s621_s26 = scalar_lea.vmem %s670_s0, %s494_s23  ;;  %s495_s27 = sshll.u32 %s173_s22, 1 }
   0xf   : > { %s626_s30 = scalar_lea.vmem %s671_s1, %s495_s27 }
  0x12   : > { %v192_v0 = vld [vmem:[%s672_s2] sm:$0xff]  ;;  %v194_v1 = vld [vmem:[%s672_s2 + $0x8] sm:$0xff] }
  0x13   : > { %193 = vst [vmem:[#allocation2] sm:$0xff] %v192_v0 }
  0x14   : > { %195 = vst [vmem:[#allocation2 + $0x8] sm:$0xff] %v194_v1 }
  0x15   : > { %201 = vsyncadd [#allocation8], 256  ;;  %v213_v2 = vld [vmem:[%s673_s3] sm:$0xff]  ;;  %v215_v3 = vld [vmem:[%s673_s3 + $0x8] sm:$0xff] }
  0x16   : > { %214 = vst [vmem:[#allocation3 + $0x8] sm:$0xff] %v213_v2 }
  0x17   : > { %216 = vst [vmem:[#allocation3] sm:$0xff] %v215_v3 }
  0x18   : > { %222 = vsyncadd [#allocation8 + $0x1], 256  ;;  %vm223_vm0 = vcmask 254976   ;;  %v567_v4 = vmov 0.0  }
  0x19   : > { %224 = vst.msk [vmem:[#allocation4] sm:$0x3] %vm223_vm0, %v567_v4 }
  0x1a   : > { %225 = vst.msk [vmem:[#allocation5] sm:$0x3] %vm223_vm0, %v567_v4 }
  0x1b   : > { %226 = vst.msk [vmem:[#allocation6] sm:$0x3] %vm223_vm0, %v567_v4 }
  0x1c   : > { %227 = vst.msk [vmem:[#allocation7] sm:$0x3] %vm223_vm0, %v567_v4 }
  0x1d   : > { %559 = dma.done.wait [#allocation8], 256 }
  0x1e   : > { %560 = vsyncadd [#allocation8], 4294967040 }
  0x1f   : > { %561 = dma.done.wait [#allocation8 + $0x1], 256 }
  0x20   : > { %562 = vsyncadd [#allocation8 + $0x1], 4294967040 }
  0x21 PF: > { %v524_v5 = vld [vmem:[#allocation2 + $0x8] sm:$0xff]  ;;  %v526_v6 = vld [vmem:[#allocation3] sm:$0xff]  ;;  %v523_v7 = vld [vmem:[#allocation2] sm:$0xff]  ;;  %s568_s14 = smov 32   ;;  %vm253_vm1 = vcmask 261120   ;;  %s569_s15 = smov 64  }
  0x22   : > { %v525_v8 = vld [vmem:[#allocation3 + $0x8] sm:$0xff]  ;;  %263 = vmatpush.bf16.msra.mxu0 %v524_v5  ;;  %299 = vmatpush.bf16.msra.mxu1 %v526_v6  ;;  %v235_v9 = vld [vmem:[#allocation4] sm:$0x3]  ;;  %v272_v10 = vld [vmem:[#allocation6] sm:$0x3]  ;;  %s570_s16 = smov 96  }
  0x23   : > { %v307_v11 = vld [vmem:[#allocation5] sm:$0x3]  ;;  %v236_v12 = vpack.c.bf16 %v235_v9, %v235_v9  ;;  %v273_v13 = vpack.c.bf16 %v272_v10, %v272_v10  ;;  %v349_v14 = vld [vmem:[#allocation7] sm:$0x3]  ;;  %v234_v15 = vld [vmem:[%s621_s26] sm:$0x3] }
  0x24   : > { %329 = vrot.lane.b32.xlu1 %v307_v11, %s568_s14  ;;  %v271_v19 = vld [vmem:[%s626_s30] sm:$0x3]  ;;  %vm395_vm10 = vcmask 254976   ;;  %s517_s17 = sshll.u32 %s607_s19, 1  ;;  %s518_s24 = sshll.u32 %s613_s20, 1 }
  0x25   : > { %s413_s23 = scalar_lea.vmem %s674_s4, %s517_s17  ;;  %s417_s27 = scalar_lea.vmem %s675_s5, %s518_s24 }
  0x26   : > { %264 = vmatpush.bf16.msra.mxu0 %v523_v7  ;;  %300 = vmatpush.bf16.msra.mxu1 %v525_v8 }
  0x29   : > { %505 = vmatmul.msk.bf16.vlgmr.msra.gmra.mxu0 %vm253_vm1, %v236_v12  ;;  %514 = vmatmul.msk.bf16.vlgmr.msra.gmra.mxu1 %vm253_vm1, %v273_v13 }
  0x2c   : > { %371 = vrot.lane.b32.xlu1 %v349_v14, %s568_s14 }
  0x96   : > { %v330_v55 = vpop.permute.xlu1 %329 }
  0x9e   : > { %v372_v59 = vpop.permute.xlu1 %371 }
  0xa6   : > { %v266_v16 = vpop.f32.mrf.mxu0  ;;  %v302_v17 = vpop.f32.mrf.mxu1 }
  0xa7   : > { %v270_v18 = vadd.f32 %v266_v16, %v234_v15  ;;  %v306_v20 = vadd.f32 %v302_v17, %v271_v19 }
  0xa9   : > { %539 = vtanh.f32 %v270_v18  ;;  %v515_v25 = vmul.f32 -1.442695, %v270_v18  ;;  %v516_v26 = vmul.f32 -1.442695, %v306_v20 }
  0xaa   : > { %541 = vtanh.f32 %v306_v20 }
  0xab   : > { %543 = vpow2.f32 %v515_v25 }
  0xac   : > { %545 = vpow2.f32 %v516_v26 }
  0xae   : > { %v268_v21 = vpop.f32.mrf.mxu0  ;;  %v304_v22 = vpop.f32.mrf.mxu1 }
  0xaf   : > { %v540_v23 = vpop.eup %539 }
  0xb0   : > { %334 = vrot.lane.b32.xlu0 %v540_v23, %s569_s15  ;;  %v542_v24 = vpop.eup %541 }
  0xb1   : > { %v544_v27 = vpop.eup %543 }
  0xb2   : > { %v311_v28 = vadd.f32 1.0, %v544_v27  ;;  %v546_v29 = vpop.eup %545 }
  0xb3   : > { %v353_v30 = vadd.f32 1.0, %v546_v29 }
  0xb4   : > { %547 = vrcp.f32 %v311_v28  ;;  %v323_v39 = vand.u32 2147483648, %v311_v28  ;;  %vm317_vm3 = vweird.f32 %v311_v28  ;;  %v321_v40 = vand.u32 2147483647, %v311_v28 }
  0xb5   : > { %549 = vrcp.f32 %v353_v30  ;;  %vm359_vm6 = vweird.f32 %v353_v30  ;;  %v365_v48 = vand.u32 2147483648, %v353_v30  ;;  %v363_v49 = vand.u32 2147483647, %v353_v30 }
  0xb6   : > { %v324_v43 = vor.u32 1.1754944e-38, %v323_v39  ;;  %vm322_vm5 = vcmp.eq.f32.partialorder %v321_v40, 8.507059e+37 }
  0xb7   : > { %v366_v51 = vor.u32 1.1754944e-38, %v365_v48  ;;  %vm364_vm9 = vcmp.eq.f32.partialorder %v363_v49, 8.507059e+37 }
  0xb8   : > { %376 = vrot.lane.b32.xlu0 %v542_v24, %s569_s15 }
  0xba   : > { %v548_v31 = vpop.eup %547 }
  0xbb   : > { %v313_v32 = vmul.f32 %v548_v31, %v311_v28  ;;  %v550_v34 = vpop.eup %549  ;;  %vm318_vm2 = vweird.f32 %v548_v31 }
  0xbc   : > { %v355_v36 = vmul.f32 %v550_v34, %v353_v30  ;;  %vm319_vm4 = vmor %vm317_vm3, %vm318_vm2  ;;  %vm360_vm7 = vweird.f32 %v550_v34 }
  0xbd   : > { %v314_v33 = vsub.f32 1.0, %v313_v32  ;;  %vm361_vm8 = vmor %vm359_vm6, %vm360_vm7 }
  0xbe   : > { %v356_v38 = vsub.f32 1.0, %v355_v36 }
  0xbf   : > { %v315_v35 = vmul.f32 %v548_v31, %v314_v33 }
  0xc0   : > { %v357_v42 = vmul.f32 %v550_v34, %v356_v38 }
  0xc1   : > { %v316_v37 = vadd.f32 %v548_v31, %v315_v35 }
  0xc2   : > { %v358_v46 = vadd.f32 %v550_v34, %v357_v42 }
  0xc3   : > { %v320_v41 = vsel %vm319_vm4, %v548_v31, %v316_v37 }
  0xc4   : > { %v325_v44 = vsel %vm322_vm5, %v324_v43, %v320_v41  ;;  %v362_v50 = vsel %vm361_vm8, %v550_v34, %v358_v46 }
  0xc5   : > { %v367_v52 = vsel %vm364_vm9, %v366_v51, %v362_v50  ;;  %v332_v56 = vmul.f32 %v330_v55, %v325_v44 }
  0xc6   : > { %v374_v60 = vmul.f32 %v372_v59, %v367_v52 }
 0x122   : > { %v335_v45 = vpop.permute.xlu0 %334 }
 0x123   : > { %v337_v47 = vmul.f32 %v335_v45, %v325_v44 }
 0x125   : > { %339 = vrot.lane.b32.xlu2 %v337_v47, %s568_s14 }
 0x12a   : > { %v377_v53 = vpop.permute.xlu0 %376 }
 0x12b   : > { %v379_v54 = vmul.f32 %v377_v53, %v367_v52 }
 0x12d   : > { %381 = vrot.lane.b32.xlu2 %v379_v54, %s568_s14 }
 0x17f   : > { %v340_v57 = vpop.permute.xlu2 %339 }
 0x180   : > { %v342_v58 = vadd.f32 %v340_v57, %v332_v56 }
 0x182   : > { %551 = vtanh.f32 %v342_v58 }
 0x187   : > { %v382_v61 = vpop.permute.xlu2 %381 }
 0x188   : > { %v552_v62 = vpop.eup %551  ;;  %v384_v63 = vadd.f32 %v382_v61, %v374_v60 }
 0x189   : > { %345 = vrot.lane.b32.xlu0 %v552_v62, %s569_s15 }
 0x18a   : > { %553 = vtanh.f32 %v384_v63 }
 0x190   : > { %v554_v0 = vpop.eup %553 }
 0x191   : > { %387 = vrot.lane.b32.xlu1 %v554_v0, %s569_s15  ;;  %398 = vrot.lane.b32.xlu0 %v342_v58, %s570_s16 }
 0x1fb   : > { %v346_v1 = vpop.permute.xlu0 %345 }
 0x1fc   : > { %v348_v2 = vmul.f32 %v346_v1, %v325_v44 }
 0x1fe   : > { %392 = vrot.lane.b32.xlu2 %v348_v2, %s568_s14 }
 0x203   : > { %v388_v3 = vpop.permute.xlu1 %387  ;;  %v399_v4 = vpop.permute.xlu0 %398 }
 0x204   : > { %v390_v5 = vmul.f32 %v388_v3, %v367_v52  ;;  %401 = vst.msk [vmem:[#allocation5] sm:$0x3] %vm395_vm10, %v399_v4 }
 0x206   : > { %403 = vrot.lane.b32.xlu1 %v390_v5, %s568_s14  ;;  %408 = vrot.lane.b32.xlu2 %v384_v63, %s570_s16 }
 0x258   : > { %v393_v6 = vpop.permute.xlu2 %392 }
 0x259   : > { %396 = vst.msk [vmem:[#allocation4] sm:$0x3] %vm395_vm10, %v393_v6 }
 0x25a   : > { %414 = vst.msk [vmem:[%s413_s23] sm:$0x3] %vm395_vm10, %v393_v6 }
 0x260   : > { %v409_v7 = vpop.permute.xlu2 %408 }
 0x261   : > { %411 = vst.msk [vmem:[#allocation7] sm:$0x3] %vm395_vm10, %v409_v7 }
 0x278   : > { %v404_v8 = vpop.permute.xlu1 %403 }
 0x279   : > { %406 = vst.msk [vmem:[#allocation6] sm:$0x3] %vm395_vm10, %v404_v8 }
 0x27a   : > { %418 = vst.msk [vmem:[%s417_s27] sm:$0x3] %vm395_vm10, %v404_v8 }
 0x27b PF: > { %s16_s18 = sadd.s32 1, %s565_s18  }
 0x27c   : > { %p13_p6 = scmp.ge.s32.totalorder %s16_s18, 10  }
 0x27e   :  { %15 = sbr.rel (!%p13_p6) target bundleno = 1 (0x1), region = 119 }
 0x283   :  { %436 = vsyncmov [#allocation8] }
 0x286   :  { %s437_s19 = vpop.sfrf %436 }
 0x287   :  { %p521_p7 = scmp.ne.s32.totalorder %s437_s19, 0 }
 0x289   :  { %441 = shalt.err (%p521_p7)  }
 0x28a   :  { %443 = vsyncmov [#allocation8 + $0x1] }
 0x28d   :  { %s444_s20 = vpop.sfrf %443 }
 0x28e   :  { %p522_p8 = scmp.ne.s32.totalorder %s444_s20, 0 }
 0x290   :  { %448 = shalt.err (%p522_p8)  }

</bundles_post_ra>
